<compile_context>
chip_gen: v5e
topology: v5e:2x2
jax: 0.10.0
libtpu: 0.0.40
codegen_flags: <defaults>
</compile_context>

<pallas_src>
import functools

import jax
import jax.numpy as jnp
from jax.experimental import pallas as pl
from jax.experimental.pallas import tpu as pltpu

_EPS = 1e-5
_MAX_BLOCK_ELEMS = 1 << 20      # 4 MiB per f32 input block (x2 inputs x2 buffers ~= 16 MiB)
_MAX_COL_TILE = 16384           # lane-aligned spatial tile for very large images
_OUT_LANES = 128                # lane-dense output block width


def _choose_tiles(n_rows, hw):
    """Pick (row_tile, col_tile) under the VMEM budget."""
    if hw * 8 <= _MAX_BLOCK_ELEMS:
        # Whole spatial extent fits in one block (legal: block dim == array dim).
        col_tile = hw
    else:
        # Tile the spatial axis at a lane-aligned width; last block is ragged.
        col_tile = _MAX_COL_TILE
    rows_budget = max(8, (_MAX_BLOCK_ELEMS // max(col_tile, 1)) // 8 * 8)
    row_tile = min(((n_rows + 7) // 8) * 8, rows_budget)
    return row_tile, col_tile


def _dice_kernel(p_ref, m_ref, o_ref, num_acc, den1_acc, den2_acc, *,
                 n_rows, hw, row_tile, col_tile, rows_ragged, cols_ragged):
    i = pl.program_id(0)   # (batch, class) row-tile axis -- "parallel"
    j = pl.program_id(1)   # spatial column-tile axis     -- "arbitrary" reduction

    @pl.when(j == 0)
    def _():
        num_acc[...] = jnp.zeros_like(num_acc)
        den1_acc[...] = jnp.zeros_like(den1_acc)
        den2_acc[...] = jnp.zeros_like(den2_acc)

    p = p_ref[...].astype(jnp.float32)
    m = m_ref[...].astype(jnp.float32)

    # Trace-time static masking: only emitted when some block overhangs the
    # array (no wrapper padding), so aligned shapes pay nothing.
    valid = None
    if rows_ragged:
        row_ids = i * row_tile + jax.lax.broadcasted_iota(jnp.int32, p.shape, 0)
        valid = row_ids < n_rows
    if cols_ragged:
        col_ids = j * col_tile + jax.lax.broadcasted_iota(jnp.int32, p.shape, 1)
        cmask = col_ids < hw
        valid = cmask if valid is None else jnp.logical_and(valid, cmask)
    if valid is not None:
        zero = jnp.float32(0.0)
        p = jnp.where(valid, p, zero)
        m = jnp.where(valid, m, zero)

    # Per-row partial reductions over this column tile, accumulated in VMEM.
    num_acc[...] += jnp.sum(p * m, axis=1, keepdims=True)
    den1_acc[...] += jnp.sum(p * p, axis=1, keepdims=True)
    den2_acc[...] += jnp.sum(m * m, axis=1, keepdims=True)

    @pl.when(j == pl.num_programs(1) - 1)
    def _():
        dice = (2.0 * num_acc[...] + _EPS) / (den1_acc[...] + den2_acc[...] + _EPS)
        o_ref[...] = jnp.broadcast_to(dice, o_ref.shape)


def dice_loss_multiclass(output, mask):
    """JAX/Pallas equivalent of DICELossMultiClass.forward(output, mask)."""
    B, C, H, W = output.shape
    assert mask.shape == output.shape
    n_rows = B * C
    hw = H * W

    # Contiguous dim-merges: free views, no HBM copy (unlike the old jnp.pad).
    p = output.reshape(n_rows, hw)
    m = mask.reshape(n_rows, hw)

    row_tile, col_tile = _choose_tiles(n_rows, hw)
    n_row_blocks = pl.cdiv(n_rows, row_tile)
    n_col_blocks = pl.cdiv(hw, col_tile)
    rows_ragged = n_row_blocks * row_tile != n_rows
    cols_ragged = n_col_blocks * col_tile != hw

    kernel = functools.partial(
        _dice_kernel, n_rows=n_rows, hw=hw, row_tile=row_tile,
        col_tile=col_tile, rows_ragged=rows_ragged, cols_ragged=cols_ragged)

    out_rows = n_row_blocks * row_tile
    bytes_accessed = (2 * n_rows * hw * p.dtype.itemsize
                      + out_rows * _OUT_LANES * 4)
    cost = pl.CostEstimate(flops=5 * n_rows * hw, transcendentals=0,
                           bytes_accessed=bytes_accessed)

    dice_rows = pl.pallas_call(
        kernel,
        out_shape=jax.ShapeDtypeStruct((out_rows, _OUT_LANES), jnp.float32),
        grid_spec=pltpu.PrefetchScalarGridSpec(
            num_scalar_prefetch=0,
            grid=(n_row_blocks, n_col_blocks),
            in_specs=[
                pl.BlockSpec((row_tile, col_tile), lambda i, j: (i, j)),
                pl.BlockSpec((row_tile, col_tile), lambda i, j: (i, j)),
            ],
            out_specs=pl.BlockSpec((row_tile, _OUT_LANES), lambda i, j: (i, 0)),
            scratch_shapes=[
                pltpu.VMEM((row_tile, 1), jnp.float32),   # num accumulator
                pltpu.VMEM((row_tile, 1), jnp.float32),   # den1 accumulator
                pltpu.VMEM((row_tile, 1), jnp.float32),   # den2 accumulator
            ],
        ),
        compiler_params=pltpu.CompilerParams(
            dimension_semantics=("parallel", "arbitrary"),
            vmem_limit_bytes=48 * 1024 * 1024,
        ),
        cost_estimate=cost,
    )(p, m)

    # Tiny final reduction (B*C floats) stays in plain JAX.
    dice_sum = jnp.sum(dice_rows[:n_rows, 0])
    return 1.0 - dice_sum / jnp.float32(n_rows)


def _reference(output, mask):
    """Pure-JAX reference mirroring the PyTorch loop semantics."""
    B, C, H, W = output.shape
    num = jnp.sum(output * mask, axis=(2, 3))            # (B, C)
    den1 = jnp.sum(output * output, axis=(2, 3))         # (B, C)
    den2 = jnp.sum(mask * mask, axis=(2, 3))             # (B, C)
    dice = (2.0 * num + _EPS) / (den1 + den2 + _EPS)     # (B, C)
    dice_eso = jnp.sum(dice, axis=1)                     # (B,)
    return 1.0 - jnp.sum(dice_eso) / (B * C)


def _make_inputs(key, B, C, H, W):
    k1, k2 = jax.random.split(key)
    logits = jax.random.normal(k1, (B, C, H, W), dtype=jnp.float32)
    probs = jax.nn.softmax(logits, axis=1)
    labels = jax.random.randint(k2, (B, H, W), 0, C)
    onehot = jax.nn.one_hot(labels, C, dtype=jnp.float32).transpose(0, 3, 1, 2)
    return probs, onehot


if __name__ == "__main__":
    # DICELossMultiClass has no learnable parameters (batch_size arg is unused).
    key = jax.random.PRNGKey(0)
    k_a, k_b = jax.random.split(key)

    # Case 1: aligned shapes (no masking code emitted).
    out_a, mask_a = _make_inputs(k_a, 2, 4, 16, 16)
    loss_a = jax.block_until_ready(dice_loss_multiclass(out_a, mask_a))
    ref_a = _reference(out_a, mask_a)
    assert jnp.allclose(loss_a, ref_a, rtol=1e-5, atol=1e-6), (loss_a, ref_a)

    # Case 2: ragged row count (B*C = 6 < row tile of 8) exercises in-kernel masking.
    out_b, mask_b = _make_inputs(k_b, 2, 3, 16, 16)
    loss_b = jax.block_until_ready(dice_loss_multiclass(out_b, mask_b))
    ref_b = _reference(out_b, mask_b)
    assert jnp.allclose(loss_b, ref_b, rtol=1e-5, atol=1e-6), (loss_b, ref_b)

    print("KERNEL_OK")
</pallas_src>

<mosaic_0001>
module attributes {stable_mosaic.version = 11 : i64} {
  func.func @_dice_kernel(%arg0: i32, %arg1: i32, %arg2: memref<8x256xf32, #tpu.memory_space<vmem>>, %arg3: memref<8x256xf32, #tpu.memory_space<vmem>>, %arg4: memref<8x128xf32, #tpu.memory_space<vmem>>, %arg5: memref<8x1xf32, #tpu.memory_space<vmem>>, %arg6: memref<8x1xf32, #tpu.memory_space<vmem>>, %arg7: memref<8x1xf32, #tpu.memory_space<vmem>>) attributes {dimension_semantics = [#tpu.dimension_semantics<parallel>, #tpu.dimension_semantics<arbitrary>], iteration_bounds = array<i64: 1, 1>, scalar_prefetch = 0 : i64, scratch_operands = 3 : i64, tpu.core_type = #tpu.core_type<tc>, window_params = [{transform_indices = @transform_0, window_bounds = array<i64: 8, 256>}, {transform_indices = @transform_1, window_bounds = array<i64: 8, 256>}, {transform_indices = @transform_2, window_bounds = array<i64: 8, 128>}]} {
    %c0_i32 = arith.constant 0 : i32
    %0 = arith.cmpi eq, %arg1, %c0_i32 : i32
    %1 = arith.extui %0 : i1 to i32
    %c0_i32_0 = arith.constant 0 : i32
    %2 = arith.cmpi ne, %1, %c0_i32_0 : i32
    scf.if %2 {
      %cst_20 = arith.constant 0.000000e+00 : f32
      %26 = vector.broadcast %cst_20 : f32 to vector<8x1xf32>
      %c0_21 = arith.constant 0 : index
      %c0_22 = arith.constant 0 : index
      %27 = vector.load %arg5[%c0_21, %c0_22] : memref<8x1xf32, #tpu.memory_space<vmem>>, vector<8x1xf32>
      tpu.vector_store %arg5[%c0_21, %c0_22], %26 {strides = array<i32>} : memref<8x1xf32, #tpu.memory_space<vmem>>, vector<8x1xf32>,
      %cst_23 = arith.constant 0.000000e+00 : f32
      %28 = vector.broadcast %cst_23 : f32 to vector<8x1xf32>
      %c0_24 = arith.constant 0 : index
      %c0_25 = arith.constant 0 : index
      %29 = vector.load %arg6[%c0_24, %c0_25] : memref<8x1xf32, #tpu.memory_space<vmem>>, vector<8x1xf32>
      tpu.vector_store %arg6[%c0_24, %c0_25], %28 {strides = array<i32>} : memref<8x1xf32, #tpu.memory_space<vmem>>, vector<8x1xf32>,
      %cst_26 = arith.constant 0.000000e+00 : f32
      %30 = vector.broadcast %cst_26 : f32 to vector<8x1xf32>
      %c0_27 = arith.constant 0 : index
      %c0_28 = arith.constant 0 : index
      %31 = vector.load %arg7[%c0_27, %c0_28] : memref<8x1xf32, #tpu.memory_space<vmem>>, vector<8x1xf32>
      tpu.vector_store %arg7[%c0_27, %c0_28], %30 {strides = array<i32>} : memref<8x1xf32, #tpu.memory_space<vmem>>, vector<8x1xf32>,
    } else {
    }
    %c0 = arith.constant 0 : index
    %c0_1 = arith.constant 0 : index
    %3 = vector.load %arg2[%c0, %c0_1] : memref<8x256xf32, #tpu.memory_space<vmem>>, vector<8x256xf32>
    %c0_2 = arith.constant 0 : index
    %c0_3 = arith.constant 0 : index
    %4 = vector.load %arg3[%c0_2, %c0_3] : memref<8x256xf32, #tpu.memory_space<vmem>>, vector<8x256xf32>
    %c0_4 = arith.constant 0 : index
    %c0_5 = arith.constant 0 : index
    %5 = vector.load %arg5[%c0_4, %c0_5] : memref<8x1xf32, #tpu.memory_space<vmem>>, vector<8x1xf32>
    %6 = arith.mulf %3, %4 : vector<8x256xf32>
    %cst = arith.constant dense<0.000000e+00> : vector<8xf32>
    %7 = vector.multi_reduction <add>, %6, %cst [1] : vector<8x256xf32> to vector<8xf32>
    %8 = vector.shape_cast %7 : vector<8xf32> to vector<8x1xf32>
    %9 = arith.addf %5, %8 : vector<8x1xf32>
    %c0_6 = arith.constant 0 : index
    %c0_7 = arith.constant 0 : index
    %10 = vector.load %arg5[%c0_6, %c0_7] : memref<8x1xf32, #tpu.memory_space<vmem>>, vector<8x1xf32>
    tpu.vector_store %arg5[%c0_6, %c0_7], %9 {strides = array<i32>} : memref<8x1xf32, #tpu.memory_space<vmem>>, vector<8x1xf32>,
    %c0_8 = arith.constant 0 : index
    %c0_9 = arith.constant 0 : index
    %11 = vector.load %arg6[%c0_8, %c0_9] : memref<8x1xf32, #tpu.memory_space<vmem>>, vector<8x1xf32>
    %12 = arith.mulf %3, %3 : vector<8x256xf32>
    %cst_10 = arith.constant dense<0.000000e+00> : vector<8xf32>
    %13 = vector.multi_reduction <add>, %12, %cst_10 [1] : vector<8x256xf32> to vector<8xf32>
    %14 = vector.shape_cast %13 : vector<8xf32> to vector<8x1xf32>
    %15 = arith.addf %11, %14 : vector<8x1xf32>
    %c0_11 = arith.constant 0 : index
    %c0_12 = arith.constant 0 : index
    %16 = vector.load %arg6[%c0_11, %c0_12] : memref<8x1xf32, #tpu.memory_space<vmem>>, vector<8x1xf32>
    tpu.vector_store %arg6[%c0_11, %c0_12], %15 {strides = array<i32>} : memref<8x1xf32, #tpu.memory_space<vmem>>, vector<8x1xf32>,
    %c0_13 = arith.constant 0 : index
    %c0_14 = arith.constant 0 : index
    %17 = vector.load %arg7[%c0_13, %c0_14] : memref<8x1xf32, #tpu.memory_space<vmem>>, vector<8x1xf32>
    %18 = arith.mulf %4, %4 : vector<8x256xf32>
    %cst_15 = arith.constant dense<0.000000e+00> : vector<8xf32>
    %19 = vector.multi_reduction <add>, %18, %cst_15 [1] : vector<8x256xf32> to vector<8xf32>
    %20 = vector.shape_cast %19 : vector<8xf32> to vector<8x1xf32>
    %21 = arith.addf %17, %20 : vector<8x1xf32>
    %c0_16 = arith.constant 0 : index
    %c0_17 = arith.constant 0 : index
    %22 = vector.load %arg7[%c0_16, %c0_17] : memref<8x1xf32, #tpu.memory_space<vmem>>, vector<8x1xf32>
    tpu.vector_store %arg7[%c0_16, %c0_17], %21 {strides = array<i32>} : memref<8x1xf32, #tpu.memory_space<vmem>>, vector<8x1xf32>,
    %c0_i32_18 = arith.constant 0 : i32
    %23 = arith.cmpi eq, %arg1, %c0_i32_18 : i32
    %24 = arith.extui %23 : i1 to i32
    %c0_i32_19 = arith.constant 0 : i32
    %25 = arith.cmpi ne, %24, %c0_i32_19 : i32
    scf.if %25 {
      %c0_20 = arith.constant 0 : index
      %c0_21 = arith.constant 0 : index
      %26 = vector.load %arg5[%c0_20, %c0_21] : memref<8x1xf32, #tpu.memory_space<vmem>>, vector<8x1xf32>
      %cst_22 = arith.constant 2.000000e+00 : f32
      %27 = vector.broadcast %cst_22 : f32 to vector<8x1xf32>
      %28 = arith.mulf %27, %26 : vector<8x1xf32>
      %cst_23 = arith.constant 9.99999974E-6 : f32
      %29 = vector.broadcast %cst_23 : f32 to vector<8x1xf32>
      %30 = arith.addf %28, %29 : vector<8x1xf32>
      %c0_24 = arith.constant 0 : index
      %c0_25 = arith.constant 0 : index
      %31 = vector.load %arg6[%c0_24, %c0_25] : memref<8x1xf32, #tpu.memory_space<vmem>>, vector<8x1xf32>
      %c0_26 = arith.constant 0 : index
      %c0_27 = arith.constant 0 : index
      %32 = vector.load %arg7[%c0_26, %c0_27] : memref<8x1xf32, #tpu.memory_space<vmem>>, vector<8x1xf32>
      %33 = arith.addf %31, %32 : vector<8x1xf32>
      %cst_28 = arith.constant 9.99999974E-6 : f32
      %34 = vector.broadcast %cst_28 : f32 to vector<8x1xf32>
      %35 = arith.addf %33, %34 : vector<8x1xf32>
      %36 = arith.divf %30, %35 : vector<8x1xf32>
      %37 = vector.shape_cast %36 : vector<8x1xf32> to vector<8x1xf32>
      %38 = vector.broadcast %37 : vector<8x1xf32> to vector<8x128xf32>
      %c0_29 = arith.constant 0 : index
      %c0_30 = arith.constant 0 : index
      %39 = vector.load %arg4[%c0_29, %c0_30] : memref<8x128xf32, #tpu.memory_space<vmem>>, vector<8x128xf32>
      tpu.vector_store %arg4[%c0_29, %c0_30], %38 {strides = array<i32>} : memref<8x128xf32, #tpu.memory_space<vmem>>, vector<8x128xf32>,
    } else {
    }
    return
  }
  func.func @transform_0(%arg0: i32, %arg1: i32) -> (i32, i32) {
    %c0_i32 = arith.constant 0 : i32
    return %arg0, %arg1 : i32, i32
  }
  func.func @transform_1(%arg0: i32, %arg1: i32) -> (i32, i32) {
    %c0_i32 = arith.constant 0 : i32
    return %arg0, %arg1 : i32, i32
  }
  func.func @transform_2(%arg0: i32, %arg1: i32) -> (i32, i32) {
    %c0_i32 = arith.constant 0 : i32
    %c0_i32_0 = arith.constant 0 : i32
    return %arg0, %c0_i32 : i32, i32
  }
}

</mosaic_0001>

<bundles_post_ra>
// kernel: tpu_custom_call.1
= control target key start
LH: loop header
LB: loop body
LE: loop exit
PB: predicated region body
PF: predicated region fallthrough
CT: control target
= control target key end

     0   :  { %7 = vsyncpa [#allocation6], 0  ;;  %s248_s0 = inlined_call_operand.hbm [shape: f32[8,256], index: 0, kind: input, shape index: {}]   ;;  %s249_s1 = inlined_call_operand.hbm [shape: f32[8,256], index: 1, kind: input, shape index: {}]   ;;  %s250_s2 = inlined_call_operand.hbm [shape: f32[8,128], index: 2, kind: output, shape index: {}]  }
   0x1   :  { %8 = vsyncpa [#allocation9], 0 }
   0x2   :  { %9 = vsyncpa [#allocation7], 0  ;;  %s15_s11 = sshll.u32 %s248_s0, 4  ;;  %s213_s12 = smov [#allocation5]   ;;  %s16_s11 = int_to_ptr.hbm [resolvable:$true] %s15_s11 }
   0x3   :  { %s17_s13 = sshll.u32 %s213_s12, 4  ;;  %s26_s16 = sshll.u32 %s249_s1, 4  ;;  %s18_s13 = int_to_ptr.vmem [resolvable:$true] %s17_s13  ;;  %s27_s16 = int_to_ptr.hbm [resolvable:$true] %s26_s16 }
   0x4   :  { %20 = dma.hbm_to_vmem [thread:$0]  %s16_s11, 256, %s18_s13, [#allocation6]  }
   0x5   :  { %s214_s17 = smov [#allocation8]  }
   0x6   :  { %s28_s18 = sshll.u32 %s214_s17, 4  ;;  %s29_s18 = int_to_ptr.vmem [resolvable:$true] %s28_s18 }
   0x7   :  { %31 = dma.hbm_to_vmem [thread:$0]  %s27_s16, 256, %s29_s18, [#allocation9]  }
   0x8   :  { %207 = dma.done.wait [#allocation6], 256  }
   0x9   :  { %208 = vsyncadd [#allocation6], 4294967040 }
   0xa   :  { %209 = dma.done.wait [#allocation9], 256  }
   0xb   :  { %210 = vsyncadd [#allocation9], 4294967040  ;;  %vm44_vm0 = vcmask 7168   ;;  %v215_v0 = vmov 0.0   ;;  %v48_v1 = vld [vmem:[#allocation5] sm:$0xff]  ;;  %v49_v2 = vld [vmem:[#allocation5 + $0x8] sm:$0xff] }
   0xc   :  { %46 = vst.msk [vmem:[#allocation3] sm:$0xff] %vm44_vm0, %v215_v0  ;;  %v50_v3 = vld [vmem:[#allocation8] sm:$0xff]  ;;  %v62_v4 = vmul.f32 %v48_v1, %v48_v1  ;;  %v63_v5 = vmul.f32 %v49_v2, %v49_v2  ;;  %v51_v6 = vld [vmem:[#allocation8 + $0x8] sm:$0xff]  ;;  %v216_v14 = vmov 0   ;;  %s217_s0 = smov [#allocation10]   ;;  %s115_s21 = sshll.u32 %s250_s2, 4  ;;  %s116_s21 = int_to_ptr.hbm [resolvable:$true] %s115_s21 }
   0xd   :  { %45 = vst.msk [vmem:[#allocation2] sm:$0xff] %vm44_vm0, %v215_v0  ;;  %v53_v7 = vmul.f32 %v50_v3, %v48_v1  ;;  %v54_v8 = vmul.f32 %v51_v6, %v49_v2  ;;  %v70_v11 = vmul.f32 %v50_v3, %v50_v3  ;;  %v71_v12 = vmul.f32 %v51_v6, %v51_v6  ;;  %s113_s1 = sshll.u32 %s217_s0, 4  ;;  %s114_s1 = int_to_ptr.vmem [resolvable:$true] %s113_s1 }
   0xe   :  { %47 = vst.msk [vmem:[#allocation4] sm:$0xff] %vm44_vm0, %v215_v0  ;;  %v64_v9 = vadd.f32 %v63_v5, %v62_v4  ;;  %131 = vset.pattern.permute.xlu1 %v216_v14  ;;  %132 = vset.pattern.permute.xlu0 %v216_v14 }
   0xf   :  { %v55_v10 = vadd.f32 %v54_v8, %v53_v7  ;;  %v72_v13 = vadd.f32 %v71_v12, %v70_v11 }
  0x10   :  { %65 = vadd.xlane.f32.xlu0 %v64_v9 }
  0x11   :  { %56 = vadd.xlane.f32.xlu1 %v55_v10 }
  0x13   :  { %v61_v15 = vld [vmem:[#allocation3] sm:$0xff] }
  0x14   :  { %v52_v16 = vld [vmem:[#allocation2] sm:$0xff] }
  0x15   :  { %v69_v21 = vld [vmem:[#allocation4] sm:$0xff] }
  0x18   :  { %73 = vadd.xlane.f32.xlu0 %v72_v13 }
  0x83   :  { %v66_v17 = vpop.xlane.xlu0 %65 }
  0x84   :  { %v67_v18 = vadd.f32 %v66_v17, %v61_v15  ;;  %v57_v19 = vpop.xlane.xlu1 %56 }
  0x85   :  { %v58_v20 = vadd.f32 %v57_v19, %v52_v16 }
  0x86   :  { %68 = vst.msk [vmem:[#allocation3] sm:$0xff] %vm44_vm0, %v67_v18 }
  0x87   :  { %60 = vst.msk [vmem:[#allocation2] sm:$0xff] %vm44_vm0, %v58_v20 }
  0x8b   :  { %v74_v22 = vpop.xlane.xlu0 %73 }
  0x8c   :  { %v75_v23 = vadd.f32 %v74_v22, %v69_v21 }
  0x8d   :  { %v83_v24 = vld [vmem:[#allocation3] sm:$0xff] }
  0x8e   :  { %76 = vst.msk [vmem:[#allocation4] sm:$0xff] %vm44_vm0, %v75_v23  ;;  %v80_v29 = vld [vmem:[#allocation2] sm:$0xff] }
  0x8f   :  { %v81_v31 = vmul.f32 2.0, %v80_v29 }
  0x91   :  { %v82_v36 = vadd.f32 1e-05, %v81_v31 }
  0x95   :  { %v84_v25 = vld [vmem:[#allocation4] sm:$0xff] }
  0x96   :  { %v85_v26 = vadd.f32 %v84_v25, %v83_v24 }
  0x98   :  { %v86_v27 = vadd.f32 1e-05, %v85_v26 }
  0x9a   :  { %133 = vrcp.f32 %v86_v27  ;;  %v98_v33 = vand.u32 2147483648, %v86_v27  ;;  %v96_v35 = vand.u32 2147483647, %v86_v27  ;;  %vm92_vm2 = vweird.f32 %v86_v27 }
  0x9c   :  { %v99_v38 = vor.u32 1.1754944e-38, %v98_v33  ;;  %vm97_vm4 = vcmp.eq.f32.partialorder %v96_v35, 8.507059e+37 }
  0xa0   :  { %v134_v28 = vpop.eup %133 }
  0xa1   :  { %v88_v30 = vmul.f32 %v134_v28, %v86_v27  ;;  %vm93_vm1 = vweird.f32 %v134_v28 }
  0xa2   :  { %vm94_vm3 = vmor %vm92_vm2, %vm93_vm1 }
  0xa3   :  { %v89_v32 = vsub.f32 1.0, %v88_v30 }
  0xa5   :  { %v90_v34 = vmul.f32 %v134_v28, %v89_v32 }
  0xa7   :  { %v91_v37 = vadd.f32 %v134_v28, %v90_v34 }
  0xa9   :  { %v95_v39 = vsel %vm94_vm3, %v134_v28, %v91_v37 }
  0xaa   :  { %v100_v40 = vsel %vm97_vm4, %v99_v38, %v95_v39 }
  0xab   :  { %v101_v41 = vmul.f32 %v100_v40, %v82_v36 }
  0xad   :  { %104 = vperm.xlu1 %131, %v101_v41  }
 0x11f   :  { %v105_v42 = vpop.permute.xlu1 %104 }
 0x120   :  { %107 = vst [vmem:[#allocation10] sm:$0xff] %v105_v42 }
 0x121   :  { %118 = dma.vmem_to_hbm [thread:$0]  %s114_s1, 128, %s116_s21, [#allocation7]  }
 0x122   :  { %211 = dma.done.wait [#allocation7], 128  }
 0x123   :  { %212 = vsyncadd [#allocation7], 4294967168 }
 0x124   :  { %123 = vsyncpa [#allocation6], 1 }
 0x125   :  { %124 = vsyncpa [#allocation9], 1 }
 0x126   :  { %125 = vsyncpa [#allocation7], 1 }

</bundles_post_ra>
